<compile_context>
chip_gen: v7x
topology: tpu7x:2x2x1
jax: 0.10.0
libtpu: 0.0.40
codegen_flags: <defaults>
</compile_context>

<pallas_src>
import jax
import jax.numpy as jnp
import numpy as np
from jax.experimental import pallas as pl
from jax.experimental.pallas import tpu as pltpu


def decoder_kernel(x_ref, hc0_ref, consts_ref, w_ref, probs_ref, hcn_ref):
    B = hcn_ref.shape[1]
    H = hcn_ref.shape[2]
    V = probs_ref.shape[1]
    T = x_ref.shape[0] // B

    # Unpack the packed constant slab / weight slab with static slices (single load each).
    w_ih = consts_ref[0:1, 0:4 * H]            # (1, 4H)   LSTM input weights (input_size == 1)
    b_gate = consts_ref[1:2, 0:4 * H]          # (1, 4H)   b_ih + b_hh
    b_lin = consts_ref[2:3, 0:V]               # (1, V)
    w_hh = w_ref[:, 0:4 * H]                   # (H, 4H)
    w_lin = w_ref[:, 4 * H:4 * H + V]          # (H, V)

    # Input-gate contributions for ALL timesteps in one vectorized op:
    #   row t*B + b  ->  x[t, b] * W_ih + bias
    gates_x = x_ref[...] * w_ih + b_gate       # (T*B, 4H)

    h = hc0_ref[0:B, :]                        # (B, H)  h_0
    c = hc0_ref[B:2 * B, :]                    # (B, H)  c_0

    def step(t, h_prev, c_prev):
        gates = gates_x[t * B:(t + 1) * B, :] + jnp.dot(
            h_prev, w_hh, preferred_element_type=jnp.float32)           # (B, 4H)
        i_g = jax.nn.sigmoid(gates[:, 0 * H:1 * H])
        f_g = jax.nn.sigmoid(gates[:, 1 * H:2 * H])
        g_g = jnp.tanh(gates[:, 2 * H:3 * H])
        o_g = jax.nn.sigmoid(gates[:, 3 * H:4 * H])
        c_new = f_g * c_prev + i_g * g_g
        h_new = o_g * jnp.tanh(c_new)
        return h_new, c_new

    # t = 0 step; its hidden output is lstm_out[0], which feeds the linear + softmax head.
    h, c = step(0, h, c)
    lin = jnp.dot(h, w_lin, preferred_element_type=jnp.float32) + b_lin  # (B, V)
    # Softmax over dim 0 (the batch dim), matching torch.nn.Softmax(dim=0).
    m = jnp.max(lin, axis=0, keepdims=True)
    e = jnp.exp(lin - m)
    probs_ref[...] = e * pl.reciprocal(jnp.sum(e, axis=0, keepdims=True), approx=True)

    # Remaining timesteps: fully unrolled static loop, (h, c) stay in vregs.
    for t in range(1, T):
        h, c = step(t, h, c)

    hcn_ref[0, :, :] = h
    hcn_ref[1, :, :] = c


def decoder_forward(params, x, hidden):
    """x: (T, B, 1) f32; hidden = (h0, c0), each (1, B, H) f32."""
    h0, c0 = hidden
    T, B, _ = x.shape
    H = params["w_hh"].shape[1]
    V = params["w_lin"].shape[0]
    W = max(4 * H, V)

    # Layout plumbing only (no compute hoisted into the wrapper).
    x_flat = x.reshape(T * B, 1).astype(jnp.float32)                         # (T*B, 1)
    hc0 = jnp.concatenate([h0[0], c0[0]], axis=0).astype(jnp.float32)        # (2B, H)

    consts = jnp.zeros((3, W), jnp.float32)
    consts = consts.at[0, :4 * H].set(params["w_ih"].reshape(4 * H))         # W_ih (input_size=1)
    consts = consts.at[1, :4 * H].set(params["b_ih"] + params["b_hh"])       # fused gate bias
    consts = consts.at[2, :V].set(params["b_lin"])

    w_cat = jnp.concatenate(
        [params["w_hh"].T, params["w_lin"].T], axis=1).astype(jnp.float32)   # (H, 4H + V)

    vmem = pl.BlockSpec(memory_space=pltpu.MemorySpace.VMEM)
    probs, hcn = pl.pallas_call(
        decoder_kernel,
        out_shape=(
            jax.ShapeDtypeStruct((B, V), jnp.float32),
            jax.ShapeDtypeStruct((2, B, H), jnp.float32),
        ),
        in_specs=[vmem] * 4,
        out_specs=(vmem, vmem),
    )(x_flat, hc0, consts, w_cat)

    return probs, (hcn[0][None], hcn[1][None])


def init_params(key, vocab_size, hidden_size):
    ks = jax.random.split(key, 6)
    s = 1.0 / float(np.sqrt(hidden_size))
    return dict(
        w_ih=jax.random.uniform(ks[0], (4 * hidden_size, 1), jnp.float32, -s, s),
        w_hh=jax.random.uniform(ks[1], (4 * hidden_size, hidden_size), jnp.float32, -s, s),
        b_ih=jax.random.uniform(ks[2], (4 * hidden_size,), jnp.float32, -s, s),
        b_hh=jax.random.uniform(ks[3], (4 * hidden_size,), jnp.float32, -s, s),
        w_lin=jax.random.uniform(ks[4], (vocab_size, hidden_size), jnp.float32, -s, s),
        b_lin=jax.random.uniform(ks[5], (vocab_size,), jnp.float32, -s, s),
    )


def reference_forward(params, x, hidden):
    """Pure-JAX reference matching torch.nn.LSTM / Linear / Softmax(dim=0) semantics."""
    h0, c0 = hidden
    T, B, _ = x.shape
    H = params["w_hh"].shape[1]
    h, c = h0[0], c0[0]
    outs = []
    for t in range(T):
        g = (x[t] @ params["w_ih"].T + params["b_ih"]
             + h @ params["w_hh"].T + params["b_hh"])
        i_g = jax.nn.sigmoid(g[:, 0 * H:1 * H])
        f_g = jax.nn.sigmoid(g[:, 1 * H:2 * H])
        g_g = jnp.tanh(g[:, 2 * H:3 * H])
        o_g = jax.nn.sigmoid(g[:, 3 * H:4 * H])
        c = f_g * c + i_g * g_g
        h = o_g * jnp.tanh(c)
        outs.append(h)
    lin = outs[0] @ params["w_lin"].T + params["b_lin"]
    probs = jax.nn.softmax(lin, axis=0)
    return probs, (h[None], c[None])


if __name__ == "__main__":
    vocab_size, hidden_size = 16, 32
    seq_len, batch = 8, 2

    key = jax.random.PRNGKey(0)
    k_p, k_x, k_h, k_c = jax.random.split(key, 4)
    params = init_params(k_p, vocab_size, hidden_size)

    x = jax.random.normal(k_x, (seq_len, batch, 1), jnp.float32)
    h0 = jax.random.normal(k_h, (1, batch, hidden_size), jnp.float32)
    c0 = jax.random.normal(k_c, (1, batch, hidden_size), jnp.float32)

    probs, (hn, cn) = decoder_forward(params, x, (h0, c0))
    jax.block_until_ready((probs, hn, cn))

    ref_probs, (ref_hn, ref_cn) = reference_forward(params, x, (h0, c0))
    np.testing.assert_allclose(np.asarray(probs), np.asarray(ref_probs), rtol=2e-2, atol=2e-2)
    np.testing.assert_allclose(np.asarray(hn), np.asarray(ref_hn), rtol=2e-2, atol=2e-2)
    np.testing.assert_allclose(np.asarray(cn), np.asarray(ref_cn), rtol=2e-2, atol=2e-2)

    assert probs.shape == (batch, vocab_size)
    assert hn.shape == (1, batch, hidden_size) and cn.shape == (1, batch, hidden_size)
    print("KERNEL_OK")
</pallas_src>

<mosaic_0001>
module attributes {stable_mosaic.version = 11 : i64} {
  func.func @decoder_kernel(%arg0: memref<16x1xf32, #tpu.memory_space<vmem>>, %arg1: memref<4x32xf32, #tpu.memory_space<vmem>>, %arg2: memref<3x128xf32, #tpu.memory_space<vmem>>, %arg3: memref<32x144xf32, #tpu.memory_space<vmem>>, %arg4: memref<2x16xf32, #tpu.memory_space<vmem>>, %arg5: memref<2x2x32xf32, #tpu.memory_space<vmem>>) attributes {dimension_semantics = [], scalar_prefetch = 0 : i64, scratch_operands = 0 : i64, tpu.core_type = #tpu.core_type<tc>} {
    %c0 = arith.constant 0 : index
    %c0_0 = arith.constant 0 : index
    %0 = vector.load %arg2[%c0, %c0_0] : memref<3x128xf32, #tpu.memory_space<vmem>>, vector<1x128xf32>
    %c1 = arith.constant 1 : index
    %c0_1 = arith.constant 0 : index
    %1 = vector.load %arg2[%c1, %c0_1] : memref<3x128xf32, #tpu.memory_space<vmem>>, vector<1x128xf32>
    %c2 = arith.constant 2 : index
    %c0_2 = arith.constant 0 : index
    %2 = vector.load %arg2[%c2, %c0_2] : memref<3x128xf32, #tpu.memory_space<vmem>>, vector<1x16xf32>
    %c0_3 = arith.constant 0 : index
    %c0_4 = arith.constant 0 : index
    %3 = vector.load %arg3[%c0_3, %c0_4] : memref<32x144xf32, #tpu.memory_space<vmem>>, vector<32x128xf32>
    %c0_5 = arith.constant 0 : index
    %c128 = arith.constant 128 : index
    %4 = vector.load %arg3[%c0_5, %c128] : memref<32x144xf32, #tpu.memory_space<vmem>>, vector<32x16xf32>
    %c0_6 = arith.constant 0 : index
    %c0_7 = arith.constant 0 : index
    %5 = vector.load %arg0[%c0_6, %c0_7] : memref<16x1xf32, #tpu.memory_space<vmem>>, vector<16x1xf32>
    %6 = vector.broadcast %5 : vector<16x1xf32> to vector<16x128xf32>
    %7 = vector.broadcast %0 : vector<1x128xf32> to vector<16x128xf32>
    %8 = arith.mulf %6, %7 : vector<16x128xf32>
    %9 = vector.broadcast %1 : vector<1x128xf32> to vector<16x128xf32>
    %10 = arith.addf %8, %9 : vector<16x128xf32>
    %c0_8 = arith.constant 0 : index
    %c0_9 = arith.constant 0 : index
    %11 = vector.load %arg1[%c0_8, %c0_9] : memref<4x32xf32, #tpu.memory_space<vmem>>, vector<2x32xf32>
    %c2_10 = arith.constant 2 : index
    %c0_11 = arith.constant 0 : index
    %12 = vector.load %arg1[%c2_10, %c0_11] : memref<4x32xf32, #tpu.memory_space<vmem>>, vector<2x32xf32>
    %13 = vector.extract_strided_slice %10 {offsets = [0, 0], sizes = [2, 128], strides = [1, 1]} : vector<16x128xf32> to vector<2x128xf32>
    %cst = arith.constant dense<0.000000e+00> : vector<2x128xf32>
    %14 = tpu.matmul %11, %3, %cst {dimension_numbers = #tpu.dot_dimension_numbers<[1], [0], [0], [1], [0, 0, 1, 1], [], []>} : vector<2x32xf32>, vector<32x128xf32>, vector<2x128xf32> -> vector<2x128xf32>
    %15 = arith.addf %13, %14 : vector<2x128xf32>
    %16 = vector.extract_strided_slice %15 {offsets = [0, 0], sizes = [2, 32], strides = [1, 1]} : vector<2x128xf32> to vector<2x32xf32>
    %17 = arith.negf %16 : vector<2x32xf32>
    %18 = math.exp %17 : vector<2x32xf32>
    %cst_12 = arith.constant 1.000000e+00 : f32
    %19 = vector.broadcast %cst_12 : f32 to vector<2x32xf32>
    %20 = arith.addf %19, %18 : vector<2x32xf32>
    %21 = arith.divf %19, %20 : vector<2x32xf32>
    %22 = vector.extract_strided_slice %15 {offsets = [0, 32], sizes = [2, 32], strides = [1, 1]} : vector<2x128xf32> to vector<2x32xf32>
    %23 = arith.negf %22 : vector<2x32xf32>
    %24 = math.exp %23 : vector<2x32xf32>
    %cst_13 = arith.constant 1.000000e+00 : f32
    %25 = vector.broadcast %cst_13 : f32 to vector<2x32xf32>
    %26 = arith.addf %25, %24 : vector<2x32xf32>
    %27 = arith.divf %25, %26 : vector<2x32xf32>
    %28 = vector.extract_strided_slice %15 {offsets = [0, 64], sizes = [2, 32], strides = [1, 1]} : vector<2x128xf32> to vector<2x32xf32>
    %29 = math.tanh %28 : vector<2x32xf32>
    %30 = vector.extract_strided_slice %15 {offsets = [0, 96], sizes = [2, 32], strides = [1, 1]} : vector<2x128xf32> to vector<2x32xf32>
    %31 = arith.negf %30 : vector<2x32xf32>
    %32 = math.exp %31 : vector<2x32xf32>
    %cst_14 = arith.constant 1.000000e+00 : f32
    %33 = vector.broadcast %cst_14 : f32 to vector<2x32xf32>
    %34 = arith.addf %33, %32 : vector<2x32xf32>
    %35 = arith.divf %33, %34 : vector<2x32xf32>
    %36 = arith.mulf %27, %12 : vector<2x32xf32>
    %37 = arith.mulf %21, %29 : vector<2x32xf32>
    %38 = arith.addf %36, %37 : vector<2x32xf32>
    %39 = math.tanh %38 : vector<2x32xf32>
    %40 = arith.mulf %35, %39 : vector<2x32xf32>
    %cst_15 = arith.constant dense<0.000000e+00> : vector<2x16xf32>
    %41 = tpu.matmul %40, %4, %cst_15 {dimension_numbers = #tpu.dot_dimension_numbers<[1], [0], [0], [1], [0, 0, 1, 1], [], []>} : vector<2x32xf32>, vector<32x16xf32>, vector<2x16xf32> -> vector<2x16xf32>
    %42 = vector.broadcast %2 : vector<1x16xf32> to vector<2x16xf32>
    %43 = arith.addf %41, %42 : vector<2x16xf32>
    %cst_16 = arith.constant dense<0xFF800000> : vector<16xf32>
    %44 = vector.multi_reduction <maximumf>, %43, %cst_16 [0] : vector<2x16xf32> to vector<16xf32>
    %45 = vector.shape_cast %44 : vector<16xf32> to vector<1x16xf32>
    %46 = vector.broadcast %45 : vector<1x16xf32> to vector<2x16xf32>
    %47 = arith.subf %43, %46 : vector<2x16xf32>
    %48 = math.exp %47 : vector<2x16xf32>
    %cst_17 = arith.constant dense<0.000000e+00> : vector<16xf32>
    %49 = vector.multi_reduction <add>, %48, %cst_17 [0] : vector<2x16xf32> to vector<16xf32>
    %50 = vector.shape_cast %49 : vector<16xf32> to vector<1x16xf32>
    %51 = tpu.reciprocal %50 {approx = true} : vector<1x16xf32> -> vector<1x16xf32>
    %52 = vector.broadcast %51 : vector<1x16xf32> to vector<2x16xf32>
    %53 = arith.mulf %48, %52 : vector<2x16xf32>
    %c0_18 = arith.constant 0 : index
    %c0_19 = arith.constant 0 : index
    %54 = vector.load %arg4[%c0_18, %c0_19] : memref<2x16xf32, #tpu.memory_space<vmem>>, vector<2x16xf32>
    tpu.vector_store %arg4[%c0_18, %c0_19], %53 {strides = array<i32>} : memref<2x16xf32, #tpu.memory_space<vmem>>, vector<2x16xf32>,
    %55 = vector.extract_strided_slice %10 {offsets = [2, 0], sizes = [2, 128], strides = [1, 1]} : vector<16x128xf32> to vector<2x128xf32>
    %cst_20 = arith.constant dense<0.000000e+00> : vector<2x128xf32>
    %56 = tpu.matmul %40, %3, %cst_20 {dimension_numbers = #tpu.dot_dimension_numbers<[1], [0], [0], [1], [0, 0, 1, 1], [], []>} : vector<2x32xf32>, vector<32x128xf32>, vector<2x128xf32> -> vector<2x128xf32>
    %57 = arith.addf %55, %56 : vector<2x128xf32>
    %58 = vector.extract_strided_slice %57 {offsets = [0, 0], sizes = [2, 32], strides = [1, 1]} : vector<2x128xf32> to vector<2x32xf32>
    %59 = arith.negf %58 : vector<2x32xf32>
    %60 = math.exp %59 : vector<2x32xf32>
    %cst_21 = arith.constant 1.000000e+00 : f32
    %61 = vector.broadcast %cst_21 : f32 to vector<2x32xf32>
    %62 = arith.addf %61, %60 : vector<2x32xf32>
    %63 = arith.divf %61, %62 : vector<2x32xf32>
    %64 = vector.extract_strided_slice %57 {offsets = [0, 32], sizes = [2, 32], strides = [1, 1]} : vector<2x128xf32> to vector<2x32xf32>
    %65 = arith.negf %64 : vector<2x32xf32>
    %66 = math.exp %65 : vector<2x32xf32>
    %cst_22 = arith.constant 1.000000e+00 : f32
    %67 = vector.broadcast %cst_22 : f32 to vector<2x32xf32>
    %68 = arith.addf %67, %66 : vector<2x32xf32>
    %69 = arith.divf %67, %68 : vector<2x32xf32>
    %70 = vector.extract_strided_slice %57 {offsets = [0, 64], sizes = [2, 32], strides = [1, 1]} : vector<2x128xf32> to vector<2x32xf32>
    %71 = math.tanh %70 : vector<2x32xf32>
    %72 = vector.extract_strided_slice %57 {offsets = [0, 96], sizes = [2, 32], strides = [1, 1]} : vector<2x128xf32> to vector<2x32xf32>
    %73 = arith.negf %72 : vector<2x32xf32>
    %74 = math.exp %73 : vector<2x32xf32>
    %cst_23 = arith.constant 1.000000e+00 : f32
    %75 = vector.broadcast %cst_23 : f32 to vector<2x32xf32>
    %76 = arith.addf %75, %74 : vector<2x32xf32>
    %77 = arith.divf %75, %76 : vector<2x32xf32>
    %78 = arith.mulf %69, %38 : vector<2x32xf32>
    %79 = arith.mulf %63, %71 : vector<2x32xf32>
    %80 = arith.addf %78, %79 : vector<2x32xf32>
    %81 = math.tanh %80 : vector<2x32xf32>
    %82 = arith.mulf %77, %81 : vector<2x32xf32>
    %83 = vector.extract_strided_slice %10 {offsets = [4, 0], sizes = [2, 128], strides = [1, 1]} : vector<16x128xf32> to vector<2x128xf32>
    %cst_24 = arith.constant dense<0.000000e+00> : vector<2x128xf32>
    %84 = tpu.matmul %82, %3, %cst_24 {dimension_numbers = #tpu.dot_dimension_numbers<[1], [0], [0], [1], [0, 0, 1, 1], [], []>} : vector<2x32xf32>, vector<32x128xf32>, vector<2x128xf32> -> vector<2x128xf32>
    %85 = arith.addf %83, %84 : vector<2x128xf32>
    %86 = vector.extract_strided_slice %85 {offsets = [0, 0], sizes = [2, 32], strides = [1, 1]} : vector<2x128xf32> to vector<2x32xf32>
    %87 = arith.negf %86 : vector<2x32xf32>
    %88 = math.exp %87 : vector<2x32xf32>
    %cst_25 = arith.constant 1.000000e+00 : f32
    %89 = vector.broadcast %cst_25 : f32 to vector<2x32xf32>
    %90 = arith.addf %89, %88 : vector<2x32xf32>
    %91 = arith.divf %89, %90 : vector<2x32xf32>
    %92 = vector.extract_strided_slice %85 {offsets = [0, 32], sizes = [2, 32], strides = [1, 1]} : vector<2x128xf32> to vector<2x32xf32>
    %93 = arith.negf %92 : vector<2x32xf32>
    %94 = math.exp %93 : vector<2x32xf32>
    %cst_26 = arith.constant 1.000000e+00 : f32
    %95 = vector.broadcast %cst_26 : f32 to vector<2x32xf32>
    %96 = arith.addf %95, %94 : vector<2x32xf32>
    %97 = arith.divf %95, %96 : vector<2x32xf32>
    %98 = vector.extract_strided_slice %85 {offsets = [0, 64], sizes = [2, 32], strides = [1, 1]} : vector<2x128xf32> to vector<2x32xf32>
    %99 = math.tanh %98 : vector<2x32xf32>
    %100 = vector.extract_strided_slice %85 {offsets = [0, 96], sizes = [2, 32], strides = [1, 1]} : vector<2x128xf32> to vector<2x32xf32>
    %101 = arith.negf %100 : vector<2x32xf32>
    %102 = math.exp %101 : vector<2x32xf32>
    %cst_27 = arith.constant 1.000000e+00 : f32
    %103 = vector.broadcast %cst_27 : f32 to vector<2x32xf32>
    %104 = arith.addf %103, %102 : vector<2x32xf32>
    %105 = arith.divf %103, %104 : vector<2x32xf32>
    %106 = arith.mulf %97, %80 : vector<2x32xf32>
    %107 = arith.mulf %91, %99 : vector<2x32xf32>
    %108 = arith.addf %106, %107 : vector<2x32xf32>
    %109 = math.tanh %108 : vector<2x32xf32>
    %110 = arith.mulf %105, %109 : vector<2x32xf32>
    %111 = vector.extract_strided_slice %10 {offsets = [6, 0], sizes = [2, 128], strides = [1, 1]} : vector<16x128xf32> to vector<2x128xf32>
    %cst_28 = arith.constant dense<0.000000e+00> : vector<2x128xf32>
    %112 = tpu.matmul %110, %3, %cst_28 {dimension_numbers = #tpu.dot_dimension_numbers<[1], [0], [0], [1], [0, 0, 1, 1], [], []>} : vector<2x32xf32>, vector<32x128xf32>, vector<2x128xf32> -> vector<2x128xf32>
    %113 = arith.addf %111, %112 : vector<2x128xf32>
    %114 = vector.extract_strided_slice %113 {offsets = [0, 0], sizes = [2, 32], strides = [1, 1]} : vector<2x128xf32> to vector<2x32xf32>
    %115 = arith.negf %114 : vector<2x32xf32>
    %116 = math.exp %115 : vector<2x32xf32>
    %cst_29 = arith.constant 1.000000e+00 : f32
    %117 = vector.broadcast %cst_29 : f32 to vector<2x32xf32>
    %118 = arith.addf %117, %116 : vector<2x32xf32>
    %119 = arith.divf %117, %118 : vector<2x32xf32>
    %120 = vector.extract_strided_slice %113 {offsets = [0, 32], sizes = [2, 32], strides = [1, 1]} : vector<2x128xf32> to vector<2x32xf32>
    %121 = arith.negf %120 : vector<2x32xf32>
    %122 = math.exp %121 : vector<2x32xf32>
    %cst_30 = arith.constant 1.000000e+00 : f32
    %123 = vector.broadcast %cst_30 : f32 to vector<2x32xf32>
    %124 = arith.addf %123, %122 : vector<2x32xf32>
    %125 = arith.divf %123, %124 : vector<2x32xf32>
    %126 = vector.extract_strided_slice %113 {offsets = [0, 64], sizes = [2, 32], strides = [1, 1]} : vector<2x128xf32> to vector<2x32xf32>
    %127 = math.tanh %126 : vector<2x32xf32>
    %128 = vector.extract_strided_slice %113 {offsets = [0, 96], sizes = [2, 32], strides = [1, 1]} : vector<2x128xf32> to vector<2x32xf32>
    %129 = arith.negf %128 : vector<2x32xf32>
    %130 = math.exp %129 : vector<2x32xf32>
    %cst_31 = arith.constant 1.000000e+00 : f32
    %131 = vector.broadcast %cst_31 : f32 to vector<2x32xf32>
    %132 = arith.addf %131, %130 : vector<2x32xf32>
    %133 = arith.divf %131, %132 : vector<2x32xf32>
    %134 = arith.mulf %125, %108 : vector<2x32xf32>
    %135 = arith.mulf %119, %127 : vector<2x32xf32>
    %136 = arith.addf %134, %135 : vector<2x32xf32>
    %137 = math.tanh %136 : vector<2x32xf32>
    %138 = arith.mulf %133, %137 : vector<2x32xf32>
    %139 = vector.extract_strided_slice %10 {offsets = [8, 0], sizes = [2, 128], strides = [1, 1]} : vector<16x128xf32> to vector<2x128xf32>
    %cst_32 = arith.constant dense<0.000000e+00> : vector<2x128xf32>
    %140 = tpu.matmul %138, %3, %cst_32 {dimension_numbers = #tpu.dot_dimension_numbers<[1], [0], [0], [1], [0, 0, 1, 1], [], []>} : vector<2x32xf32>, vector<32x128xf32>, vector<2x128xf32> -> vector<2x128xf32>
    %141 = arith.addf %139, %140 : vector<2x128xf32>
    %142 = vector.extract_strided_slice %141 {offsets = [0, 0], sizes = [2, 32], strides = [1, 1]} : vector<2x128xf32> to vector<2x32xf32>
    %143 = arith.negf %142 : vector<2x32xf32>
    %144 = math.exp %143 : vector<2x32xf32>
    %cst_33 = arith.constant 1.000000e+00 : f32
    %145 = vector.broadcast %cst_33 : f32 to vector<2x32xf32>
    %146 = arith.addf %145, %144 : vector<2x32xf32>
    %147 = arith.divf %145, %146 : vector<2x32xf32>
    %148 = vector.extract_strided_slice %141 {offsets = [0, 32], sizes = [2, 32], strides = [1, 1]} : vector<2x128xf32> to vector<2x32xf32>
    %149 = arith.negf %148 : vector<2x32xf32>
    %150 = math.exp %149 : vector<2x32xf32>
    %cst_34 = arith.constant 1.000000e+00 : f32
    %151 = vector.broadcast %cst_34 : f32 to vector<2x32xf32>
    %152 = arith.addf %151, %150 : vector<2x32xf32>
    %153 = arith.divf %151, %152 : vector<2x32xf32>
    %154 = vector.extract_strided_slice %141 {offsets = [0, 64], sizes = [2, 32], strides = [1, 1]} : vector<2x128xf32> to vector<2x32xf32>
    %155 = math.tanh %154 : vector<2x32xf32>
    %156 = vector.extract_strided_slice %141 {offsets = [0, 96], sizes = [2, 32], strides = [1, 1]} : vector<2x128xf32> to vector<2x32xf32>
    %157 = arith.negf %156 : vector<2x32xf32>
    %158 = math.exp %157 : vector<2x32xf32>
    %cst_35 = arith.constant 1.000000e+00 : f32
    %159 = vector.broadcast %cst_35 : f32 to vector<2x32xf32>
    %160 = arith.addf %159, %158 : vector<2x32xf32>
    %161 = arith.divf %159, %160 : vector<2x32xf32>
    %162 = arith.mulf %153, %136 : vector<2x32xf32>
    %163 = arith.mulf %147, %155 : vector<2x32xf32>
    %164 = arith.addf %162, %163 : vector<2x32xf32>
    %165 = math.tanh %164 : vector<2x32xf32>
    %166 = arith.mulf %161, %165 : vector<2x32xf32>
    %167 = vector.extract_strided_slice %10 {offsets = [10, 0], sizes = [2, 128], strides = [1, 1]} : vector<16x128xf32> to vector<2x128xf32>
    %cst_36 = arith.constant dense<0.000000e+00> : vector<2x128xf32>
    %168 = tpu.matmul %166, %3, %cst_36 {dimension_numbers = #tpu.dot_dimension_numbers<[1], [0], [0], [1], [0, 0, 1, 1], [], []>} : vector<2x32xf32>, vector<32x128xf32>, vector<2x128xf32> -> vector<2x128xf32>
    %169 = arith.addf %167, %168 : vector<2x128xf32>
    %170 = vector.extract_strided_slice %169 {offsets = [0, 0], sizes = [2, 32], strides = [1, 1]} : vector<2x128xf32> to vector<2x32xf32>
    %171 = arith.negf %170 : vector<2x32xf32>
    %172 = math.exp %171 : vector<2x32xf32>
    %cst_37 = arith.constant 1.000000e+00 : f32
    %173 = vector.broadcast %cst_37 : f32 to vector<2x32xf32>
    %174 = arith.addf %173, %172 : vector<2x32xf32>
    %175 = arith.divf %173, %174 : vector<2x32xf32>
    %176 = vector.extract_strided_slice %169 {offsets = [0, 32], sizes = [2, 32], strides = [1, 1]} : vector<2x128xf32> to vector<2x32xf32>
    %177 = arith.negf %176 : vector<2x32xf32>
    %178 = math.exp %177 : vector<2x32xf32>
    %cst_38 = arith.constant 1.000000e+00 : f32
    %179 = vector.broadcast %cst_38 : f32 to vector<2x32xf32>
    %180 = arith.addf %179, %178 : vector<2x32xf32>
    %181 = arith.divf %179, %180 : vector<2x32xf32>
    %182 = vector.extract_strided_slice %169 {offsets = [0, 64], sizes = [2, 32], strides = [1, 1]} : vector<2x128xf32> to vector<2x32xf32>
    %183 = math.tanh %182 : vector<2x32xf32>
    %184 = vector.extract_strided_slice %169 {offsets = [0, 96], sizes = [2, 32], strides = [1, 1]} : vector<2x128xf32> to vector<2x32xf32>
    %185 = arith.negf %184 : vector<2x32xf32>
    %186 = math.exp %185 : vector<2x32xf32>
    %cst_39 = arith.constant 1.000000e+00 : f32
    %187 = vector.broadcast %cst_39 : f32 to vector<2x32xf32>
    %188 = arith.addf %187, %186 : vector<2x32xf32>
    %189 = arith.divf %187, %188 : vector<2x32xf32>
    %190 = arith.mulf %181, %164 : vector<2x32xf32>
    %191 = arith.mulf %175, %183 : vector<2x32xf32>
    %192 = arith.addf %190, %191 : vector<2x32xf32>
    %193 = math.tanh %192 : vector<2x32xf32>
    %194 = arith.mulf %189, %193 : vector<2x32xf32>
    %195 = vector.extract_strided_slice %10 {offsets = [12, 0], sizes = [2, 128], strides = [1, 1]} : vector<16x128xf32> to vector<2x128xf32>
    %cst_40 = arith.constant dense<0.000000e+00> : vector<2x128xf32>
    %196 = tpu.matmul %194, %3, %cst_40 {dimension_numbers = #tpu.dot_dimension_numbers<[1], [0], [0], [1], [0, 0, 1, 1], [], []>} : vector<2x32xf32>, vector<32x128xf32>, vector<2x128xf32> -> vector<2x128xf32>
    %197 = arith.addf %195, %196 : vector<2x128xf32>
    %198 = vector.extract_strided_slice %197 {offsets = [0, 0], sizes = [2, 32], strides = [1, 1]} : vector<2x128xf32> to vector<2x32xf32>
    %199 = arith.negf %198 : vector<2x32xf32>
    %200 = math.exp %199 : vector<2x32xf32>
    %cst_41 = arith.constant 1.000000e+00 : f32
    %201 = vector.broadcast %cst_41 : f32 to vector<2x32xf32>
    %202 = arith.addf %201, %200 : vector<2x32xf32>
    %203 = arith.divf %201, %202 : vector<2x32xf32>
    %204 = vector.extract_strided_slice %197 {offsets = [0, 32], sizes = [2, 32], strides = [1, 1]} : vector<2x128xf32> to vector<2x32xf32>
    %205 = arith.negf %204 : vector<2x32xf32>
    %206 = math.exp %205 : vector<2x32xf32>
    %cst_42 = arith.constant 1.000000e+00 : f32
    %207 = vector.broadcast %cst_42 : f32 to vector<2x32xf32>
    %208 = arith.addf %207, %206 : vector<2x32xf32>
    %209 = arith.divf %207, %208 : vector<2x32xf32>
    %210 = vector.extract_strided_slice %197 {offsets = [0, 64], sizes = [2, 32], strides = [1, 1]} : vector<2x128xf32> to vector<2x32xf32>
    %211 = math.tanh %210 : vector<2x32xf32>
    %212 = vector.extract_strided_slice %197 {offsets = [0, 96], sizes = [2, 32], strides = [1, 1]} : vector<2x128xf32> to vector<2x32xf32>
    %213 = arith.negf %212 : vector<2x32xf32>
    %214 = math.exp %213 : vector<2x32xf32>
    %cst_43 = arith.constant 1.000000e+00 : f32
    %215 = vector.broadcast %cst_43 : f32 to vector<2x32xf32>
    %216 = arith.addf %215, %214 : vector<2x32xf32>
    %217 = arith.divf %215, %216 : vector<2x32xf32>
    %218 = arith.mulf %209, %192 : vector<2x32xf32>
    %219 = arith.mulf %203, %211 : vector<2x32xf32>
    %220 = arith.addf %218, %219 : vector<2x32xf32>
    %221 = math.tanh %220 : vector<2x32xf32>
    %222 = arith.mulf %217, %221 : vector<2x32xf32>
    %223 = vector.extract_strided_slice %10 {offsets = [14, 0], sizes = [2, 128], strides = [1, 1]} : vector<16x128xf32> to vector<2x128xf32>
    %cst_44 = arith.constant dense<0.000000e+00> : vector<2x128xf32>
    %224 = tpu.matmul %222, %3, %cst_44 {dimension_numbers = #tpu.dot_dimension_numbers<[1], [0], [0], [1], [0, 0, 1, 1], [], []>} : vector<2x32xf32>, vector<32x128xf32>, vector<2x128xf32> -> vector<2x128xf32>
    %225 = arith.addf %223, %224 : vector<2x128xf32>
    %226 = vector.extract_strided_slice %225 {offsets = [0, 0], sizes = [2, 32], strides = [1, 1]} : vector<2x128xf32> to vector<2x32xf32>
    %227 = arith.negf %226 : vector<2x32xf32>
    %228 = math.exp %227 : vector<2x32xf32>
    %cst_45 = arith.constant 1.000000e+00 : f32
    %229 = vector.broadcast %cst_45 : f32 to vector<2x32xf32>
    %230 = arith.addf %229, %228 : vector<2x32xf32>
    %231 = arith.divf %229, %230 : vector<2x32xf32>
    %232 = vector.extract_strided_slice %225 {offsets = [0, 32], sizes = [2, 32], strides = [1, 1]} : vector<2x128xf32> to vector<2x32xf32>
    %233 = arith.negf %232 : vector<2x32xf32>
    %234 = math.exp %233 : vector<2x32xf32>
    %cst_46 = arith.constant 1.000000e+00 : f32
    %235 = vector.broadcast %cst_46 : f32 to vector<2x32xf32>
    %236 = arith.addf %235, %234 : vector<2x32xf32>
    %237 = arith.divf %235, %236 : vector<2x32xf32>
    %238 = vector.extract_strided_slice %225 {offsets = [0, 64], sizes = [2, 32], strides = [1, 1]} : vector<2x128xf32> to vector<2x32xf32>
    %239 = math.tanh %238 : vector<2x32xf32>
    %240 = vector.extract_strided_slice %225 {offsets = [0, 96], sizes = [2, 32], strides = [1, 1]} : vector<2x128xf32> to vector<2x32xf32>
    %241 = arith.negf %240 : vector<2x32xf32>
    %242 = math.exp %241 : vector<2x32xf32>
    %cst_47 = arith.constant 1.000000e+00 : f32
    %243 = vector.broadcast %cst_47 : f32 to vector<2x32xf32>
    %244 = arith.addf %243, %242 : vector<2x32xf32>
    %245 = arith.divf %243, %244 : vector<2x32xf32>
    %246 = arith.mulf %237, %220 : vector<2x32xf32>
    %247 = arith.mulf %231, %239 : vector<2x32xf32>
    %248 = arith.addf %246, %247 : vector<2x32xf32>
    %249 = math.tanh %248 : vector<2x32xf32>
    %250 = arith.mulf %245, %249 : vector<2x32xf32>
    %c0_48 = arith.constant 0 : index
    %c0_49 = arith.constant 0 : index
    %c0_50 = arith.constant 0 : index
    %251 = vector.load %arg5[%c0_48, %c0_49, %c0_50] : memref<2x2x32xf32, #tpu.memory_space<vmem>>, vector<1x2x32xf32>
    %252 = vector.shape_cast %251 : vector<1x2x32xf32> to vector<2x32xf32>
    %253 = vector.shape_cast %250 : vector<2x32xf32> to vector<1x2x32xf32>
    tpu.vector_store %arg5[%c0_48, %c0_49, %c0_50], %253 {strides = array<i32>} : memref<2x2x32xf32, #tpu.memory_space<vmem>>, vector<1x2x32xf32>,
    %c1_51 = arith.constant 1 : index
    %c0_52 = arith.constant 0 : index
    %c0_53 = arith.constant 0 : index
    %254 = vector.load %arg5[%c1_51, %c0_52, %c0_53] : memref<2x2x32xf32, #tpu.memory_space<vmem>>, vector<1x2x32xf32>
    %255 = vector.shape_cast %254 : vector<1x2x32xf32> to vector<2x32xf32>
    %256 = vector.shape_cast %248 : vector<2x32xf32> to vector<1x2x32xf32>
    tpu.vector_store %arg5[%c1_51, %c0_52, %c0_53], %256 {strides = array<i32>} : memref<2x2x32xf32, #tpu.memory_space<vmem>>, vector<1x2x32xf32>,
    return
  }
}

</mosaic_0001>

<bundles_post_ra>
// kernel: tpu_custom_call.1
= control target key start
LH: loop header
LB: loop body
LE: loop exit
PB: predicated region body
PF: predicated region fallthrough
CT: control target
= control target key end

     0   :  { %11 = vsyncpa [#allocation3], 0  ;;  %s1656_s0 = inlined_call_operand.vmem [shape: f32[16,1], index: 0, kind: input, shape index: {}]   ;;  %s1657_s1 = inlined_call_operand.vmem [shape: f32[4,32], index: 1, kind: input, shape index: {}]   ;;  %s1658_s2 = inlined_call_operand.vmem [shape: f32[3,128], index: 2, kind: input, shape index: {}]   ;;  %s1659_s3 = inlined_call_operand.hbm [shape: f32[32,144], index: 3, kind: input, shape index: {}]   ;;  %s1660_s4 = inlined_call_operand.hbm [shape: f32[2,16], index: 4, kind: output, shape index: {0}]   ;;  %s1661_s5 = inlined_call_operand.hbm [shape: f32[2,2,32], index: 5, kind: output, shape index: {1}]  }
   0x1   :  { %12 = vsyncpa [#allocation4], 0 }
   0x2   :  { %13 = vsyncpa [#allocation7], 0  ;;  %s1429_s18 = smov [#allocation2]   ;;  %s1357_s22 = scalar_lea.hbm %s1659_s3, 1024 }
   0x3   :  { %s25_s19 = sshll.u32 %s1429_s18, 4  ;;  %p1358_p0 = scmp.ne.s32.totalorder %s1659_s3, %s1357_s22  ;;  %s26_s19 = int_to_ptr.vmem [resolvable:$true] %s25_s19 }
   0x4   :  { %p1361_p1 = scmp.lt.u32.totalorder %s1357_s22, %s1659_s3 }
   0x6   :  { %p1363_p2 = pnand %p1361_p1, %p1358_p0 }
   0x8   :  { %1366 = shalt.err (!%p1363_p2)
}
   0x9   :  { %s1367_s27 = scalar_lea.vmem %s26_s19, 1024  ;;  %p1372_p4 = scmp.lt.s32.totalorder %s26_s19, %s26_s19 }
   0xa   :  { %p1368_p3 = scmp.ne.s32.totalorder %s26_s19, %s1367_s27  ;;  %p1373_p5 = scmp.lt.s32.totalorder %s1367_s27, %s1367_s27 }
   0xc   :  { %p1374_p6 = por %p1373_p5, %p1372_p4 }
   0xe   :  { %p1375_p7 = pnand %p1374_p6, %p1368_p3 }
  0x10   :  { %1378 = shalt.err (!%p1375_p7)
}
  0x11   :  { %s1430_s28 = smov 256   ;;  %s1431_s29 = smov 16  }
  0x12   :  { %31 = dma.hbm_to_vmem [thread:$0]  %s1659_s3, 1024, %s26_s19, [#allocation3], %s1430_s28, %s1430_s28, %s1431_s29  }
  0x13   :  { %1423 = dma.done.wait [#allocation3], 1024  }
  0x14   :  { %1424 = vsyncadd [#allocation3], 4294966272  ;;  %v1432_v0 = vmov 0.0|0.0   ;;  %vm1433_vm0 = vmmov 0   ;;  %v1434_v1 = vmov 0.0   ;;  %v1435_v2 = vmov 0  }
  0x15   :  { %1221 = vmatprep.subr.bf16.mxu0 %v1432_v0  ;;  %1130 = vmatprep.mubr.msk.f32.mxu0 %vm1433_vm0, %v1434_v1  ;;  %v38_v3 = vld [vmem:[#allocation2] sm:$0xff]  ;;  %v39_v4 = vld [vmem:[#allocation2 + $0x10] sm:$0xff]  ;;  %s1436_s10 = smov 32   ;;  %vm72_vm1 = vcmask 261120   ;;  %s1437_s16 = smov 64   ;;  %v42_v31 = vld [vmem:[#allocation2 + $0x8] sm:$0xff] }
  0x16   :  { %1288 = vset.pattern.permute.xlu0 %v1435_v2  ;;  %1227 = vmatprep.subr.bf16.mxu1 %v1432_v0  ;;  %v40_v5 = vld [vmem:[#allocation2 + $0x20] sm:$0xff]  ;;  %v1490_v6 = vpack.c.bf16 %v39_v4, %v38_v3  ;;  %v41_v7 = vld [vmem:[#allocation2 + $0x30] sm:$0xff]  ;;  %v43_v32 = vld [vmem:[#allocation2 + $0x18] sm:$0xff]  ;;  %vm254_vm2 = vcmask 123904   ;;  %s1439_s20 = smov [#allocation5]  }
  0x17   :  { %1141 = vmatprep.mubr.msk.f32.mxu1 %vm1433_vm0, %v1434_v1  ;;  %v46_v8 = vld [vmem:[%s1656_s0] sm:$0xff]  ;;  %v1499_v10 = vpack.c.bf16 %v41_v7, %v40_v5  ;;  %v44_v33 = vld [vmem:[#allocation2 + $0x28] sm:$0xff]  ;;  %v1228_v34 = vpack.c.bf16 %v43_v32, %v42_v31  ;;  %v45_v35 = vld [vmem:[#allocation2 + $0x38] sm:$0xff]  ;;  %s1032_s21 = sshll.u32 %s1439_s20, 4  ;;  %s1033_s21 = int_to_ptr.vmem [resolvable:$true] %s1032_s21 }
  0x18   :  { %50 = vperm.xlu0 %1288, %v46_v8   ;;  %v71_v9 = vld [vmem:[%s1657_s1 + $0x2] sm:$0x3]  ;;  %1223 = vmatpush3.bf16.msra.mxu0 %v1490_v6  ;;  %v70_v11 = vld [vmem:[%s1657_s1] sm:$0x3]  ;;  %v1231_v36 = vpack.c.bf16 %v45_v35, %v44_v33  ;;  %s1379_s22 = scalar_lea.vmem %s1033_s21, 32  ;;  %p1384_p9 = scmp.lt.s32.totalorder %s1033_s21, %s1033_s21 }
  0x19   :  { %155 = vrot.lane.b32.xlu1 %v71_v9, %s1436_s10  ;;  %1224 = vmatprep.subr.bf16.mxu0 %v1432_v0  ;;  %v1518_v13 = vld [vmem:[%s1658_s2] ss:$0 sm:$0xff]  ;;  %v1524_v15 = vld [vmem:[%s1658_s2 + $0x1] ss:$0 sm:$0xff]  ;;  %v1061_v41 = vld [vmem:[%s1658_s2 + $0x2] ss:$0 sm:$0xff]  ;;  %p1380_p8 = scmp.ne.s32.totalorder %s1033_s21, %s1379_s22  ;;  %p1385_p10 = scmp.lt.s32.totalorder %s1379_s22, %s1379_s22 }
  0x1a   :  { %1229 = vmatpush3.bf16.msra.mxu1 %v1228_v34 }
  0x1b   :  { %1230 = vmatprep.subr.bf16.mxu1 %v1432_v0  ;;  %p1386_p11 = por %p1385_p10, %p1384_p9 }
  0x1c   :  { %1226 = vmatpush3.bf16.msra.mxu0 %v1499_v10 }
  0x1d   :  { %1233 = vmatprep.subr.bf16.mxu0 %v1432_v0  ;;  %p1387_p12 = pnand %p1386_p11, %p1380_p8 }
  0x1e   :  { %1232 = vmatpush3.bf16.msra.mxu1 %v1231_v36 }
  0x1f   :  { %1131 = vmatmul.mubr.msk.f32.vlgmr.msra.gmra.mrb[0].mxu0 %vm72_vm1, %v70_v11  ;;  %1239 = vmatprep.subr.bf16.mxu1 %v1432_v0 }
  0x20   :  { %1235 = vmatpush3.bf16.msra.mxu0 %v1490_v6  ;;  %1152 = vmatprep.mubr.msk.f32.mxu0 %vm1433_vm0, %v1434_v1 }
  0x21   :  { %1236 = vmatprep.subr.bf16.mxu0 %v1432_v0 }
  0x24   :  { %1238 = vmatpush3.bf16.msra.mxu0 %v1499_v10 }
  0x25   :  { %1245 = vmatprep.subr.bf16.mxu0 %v1432_v0 }
  0x8b   :  { %v156_v27 = vpop.permute.xlu1 %155 }
  0x97   :  { %v51_v12 = vpop.permute.xlu0 %50 }
  0x98   :  { %v62_v14 = vmul.f32 %v1518_v13, %v51_v12 }
  0x9a   :  { %v1527_v16 = vadd.f32 %v1524_v15, %v62_v14 }
  0xf2   :  { %v142_v17 = vpop.f32.mrb[0].mxu0 }
  0xf3   :  { %v146_v18 = vadd.f32 %v142_v17, %v1527_v16  ;;  %v1132_v19 = vpop.f32.mrb[1].mxu0 }
  0xf5   :  { %1289 = vtanh.f32 %v146_v18  ;;  %v1060_v21 = vmul.f32 -1.442695, %v146_v18 }
  0xf7   :  { %1291 = vpow2.f32 %v1060_v21 }
  0xff   :  { %v1290_v20 = vpop.eup %1289 }
 0x100   :  { %160 = vrot.lane.b32.xlu0 %v1290_v20, %s1437_s16 }
 0x101   :  { %v1292_v22 = vpop.eup %1291 }
 0x102   :  { %v150_v23 = vadd.f32 1.0, %v1292_v22 }
 0x104   :  { %1293 = vrcp.f32 %v150_v23 }
 0x10e   :  { %v1294_v24 = vpop.eup %1293 }
 0x10f   :  { %v158_v28 = vmul.f32 %v1294_v24, %v156_v27 }
 0x172   :  { %v161_v25 = vpop.permute.xlu0 %160 }
 0x173   :  { %v163_v26 = vmul.f32 %v1294_v24, %v161_v25 }
 0x175   :  { %165 = vrot.lane.b32.xlu1 %v163_v26, %s1436_s10 }
 0x1e7   :  { %v166_v29 = vpop.permute.xlu1 %165 }
 0x1e8   :  { %v1532_v30 = vadd.f32 %v166_v29, %v158_v28 }
 0x1ea   :  { %1295 = vtanh.f32 %v1532_v30  ;;  %v357_v18 = vrot.slane %v1532_v30, 6 }
 0x1f4   :  { %v1296_v37 = vpop.eup %1295 }
 0x1f5   :  { %171 = vrot.lane.b32.xlu0 %v1296_v37, %s1437_s16 }
 0x267   :  { %v172_v38 = vpop.permute.xlu0 %171 }
 0x268   :  { %v174_v39 = vmul.f32 %v1294_v24, %v172_v38 }
 0x26a   :  { %180 = vrot.lane.b32.xlu1 %v174_v39, %s1436_s10 }
 0x2dc   :  { %v181_v40 = vpop.permute.xlu1 %180 }
 0x2dd   :  { %1142 = vmatmul.mubr.msk.f32.vlgmr.msra.gmra.mrb[0].mxu1 %vm72_vm1, %v181_v40  ;;  %1153 = vmatmul.mubr.msk.f32.vlgmr.msra.gmra.mrb[2].mxu0 %vm72_vm1, %v181_v40 }
 0x2de   :  { %1241 = vmatpush3.bf16.msra.mxu1 %v1490_v6  ;;  %1163 = vmatprep.mubr.msk.f32.mxu1 %vm1433_vm0, %v1434_v1 }
 0x2df   :  { %1242 = vmatprep.subr.bf16.mxu1 %v1432_v0  ;;  %1247 = vmatpush3.bf16.msra.mxu0 %v1490_v6 }
 0x2e0   :  { %1248 = vmatprep.subr.bf16.mxu0 %v1432_v0  ;;  %1174 = vmatprep.mubr.msk.f32.mxu0 %vm1433_vm0, %v1434_v1 }
 0x2e2   :  { %1244 = vmatpush3.bf16.msra.mxu1 %v1499_v10 }
 0x2e3   :  { %1250 = vmatpush3.bf16.msra.mxu0 %v1499_v10  ;;  %1251 = vmatprep.subr.bf16.mxu1 %v1432_v0 }
 0x2e4   :  { %1257 = vmatprep.subr.bf16.mxu0 %v1432_v0 }
 0x3b0   :  { %v250_v42 = vpop.f32.mrb[0].mxu1  ;;  %v341_v43 = vpop.f32.mrb[2].mxu0 }
 0x3b1   :  { %v251_v44 = vadd.f32 %v1061_v41, %v250_v42  ;;  %v346_v45 = vrot.slane %v341_v43, 6  ;;  %v1143_v46 = vpop.f32.mrb[1].mxu1  ;;  %v1154_v47 = vpop.f32.mrb[3].mxu0 }
 0x3b3   :  { %v255_v48 = vsel %vm254_vm2, %v251_v44, -inf  ;;  %v348_v49 = vadd.f32 %v346_v45, %v1527_v16 }
 0x3b4   :  { %v256_v50 = vrot.slane %v255_v48, 4 }
 0x3b5   :  { %1297 = vtanh.f32 %v348_v49  ;;  %v1064_v8 = vmul.f32 -1.442695, %v348_v49 }
 0x3b6   :  { %v257_v51 = vmax.f32 %v255_v48, %v256_v50 }
 0x3b8   :  { %v258_v52 = vrot.slane %v257_v51, 2 }
 0x3ba   :  { %v259_v53 = vmax.f32 %v257_v51, %v258_v52 }
 0x3bc   :  { %v260_v54 = vrot.slane %v259_v53, 1 }
 0x3be   :  { %v261_v55 = vmax.f32 %v259_v53, %v260_v54 }
 0x3bf   :  { %v1298_v56 = vpop.eup %1297 }
 0x3c0   :  { %v262_v57 = vsub.f32 %v251_v44, %v261_v55  ;;  %361 = vrot.lane.b32.xlu0 %v1298_v56, %s1437_s16 }
 0x3c2   :  { %v263_v58 = vmul.f32 1.442695, %v262_v57 }
 0x3c4   :  { %1299 = vpow2.f32 %v263_v58 }
 0x3ce   :  { %v1300_v59 = vpop.eup %1299 }
 0x3cf   :  { %v265_v60 = vsel %vm254_vm2, %v1300_v59, 0.0 }
 0x3d0   :  { %v266_v61 = vrot.slane %v265_v60, 4 }
 0x3d2   :  { %v267_v62 = vadd.f32 %v266_v61, %v265_v60 }
 0x3d4   :  { %v268_v63 = vrot.slane %v267_v62, 2 }
 0x3d6   :  { %v269_v2 = vadd.f32 %v268_v63, %v267_v62  ;;  %v47_v62 = vld [vmem:[%s1656_s0 + $0x8] sm:$0xff]  ;;  %s1438_s0 = smov 96  }
 0x3d8   :  { %v270_v3 = vrot.slane %v269_v2, 1 }
 0x3da   :  { %v271_v4 = vadd.f32 %v270_v3, %v269_v2 }
 0x3dc   :  { %1301 = vrcp.f32 %v271_v4 }
 0x3dd   :  { %1303 = vpow2.f32 %v1064_v8 }
 0x3e6   :  { %v1302_v5 = vpop.eup %1301 }
 0x3e7   :  { %v273_v7 = vmul.f32 %v1302_v5, %v1300_v59  ;;  %v1304_v9 = vpop.eup %1303 }
 0x3e8   :  { %v352_v11 = vadd.f32 1.0, %v1304_v9 }
 0x3e9   :  { %274 = vst.msk [vmem:[#allocation5] sm:$0x3] %vm254_vm2, %v273_v7 }
 0x3ea   :  { %1305 = vrcp.f32 %v352_v11 }
 0x3f4   :  { %v1306_v12 = vpop.eup %1305 }
 0x3f5   :  { %v359_v19 = vmul.f32 %v1306_v12, %v357_v18 }
 0x432   :  { %v362_v14 = vpop.permute.xlu0 %361 }
 0x433   :  { %v364_v17 = vmul.f32 %v1306_v12, %v362_v14 }
 0x435   :  { %366 = vrot.lane.b32.xlu1 %v364_v17, %s1436_s10 }
 0x4a7   :  { %v367_v20 = vpop.permute.xlu1 %366 }
 0x4a8   :  { %v369_v21 = vadd.f32 %v367_v20, %v359_v19 }
 0x4aa   :  { %1307 = vtanh.f32 %v369_v21  ;;  %v464_v38 = vrot.slane %v369_v21, 6 }
 0x4b4   :  { %v1308_v22 = vpop.eup %1307 }
 0x4b5   :  { %372 = vrot.lane.b32.xlu0 %v1308_v22, %s1437_s16 }
 0x527   :  { %v373_v23 = vpop.permute.xlu0 %372 }
 0x528   :  { %v375_v24 = vmul.f32 %v1306_v12, %v373_v23 }
 0x52a   :  { %v377_v25 = vrot.slane %v375_v24, 2 }
 0x52c   :  { %378 = vrot.lane.b32.xlu1 %v377_v25, %s1436_s10 }
 0x59e   :  { %v379_v26 = vpop.permute.xlu1 %378 }
 0x59f   :  { %1164 = vmatmul.mubr.msk.f32.vlgmr.msra.gmra.mrb[2].mxu1 %vm72_vm1, %v379_v26 }
 0x5a0   :  { %1253 = vmatpush3.bf16.msra.mxu1 %v1490_v6  ;;  %1185 = vmatprep.mubr.msk.f32.mxu1 %vm1433_vm0, %v1434_v1 }
 0x5a1   :  { %1254 = vmatprep.subr.bf16.mxu1 %v1432_v0 }
 0x5a4   :  { %1256 = vmatpush3.bf16.msra.mxu1 %v1499_v10 }
 0x5a5   :  { %1263 = vmatprep.subr.bf16.mxu1 %v1432_v0 }
 0x672   :  { %v448_v27 = vpop.f32.mrb[2].mxu1 }
 0x673   :  { %v453_v28 = vrot.slane %v448_v27, 4  ;;  %v1165_v29 = vpop.f32.mrb[3].mxu1 }
 0x675   :  { %v455_v30 = vadd.f32 %v453_v28, %v1527_v16 }
 0x677   :  { %1309 = vtanh.f32 %v455_v30  ;;  %v1066_v32 = vmul.f32 -1.442695, %v455_v30 }
 0x679   :  { %1311 = vpow2.f32 %v1066_v32 }
 0x681   :  { %v1310_v31 = vpop.eup %1309 }
 0x682   :  { %468 = vrot.lane.b32.xlu0 %v1310_v31, %s1437_s16 }
 0x683   :  { %v1312_v33 = vpop.eup %1311 }
 0x684   :  { %v459_v34 = vadd.f32 1.0, %v1312_v33 }
 0x686   :  { %1313 = vrcp.f32 %v459_v34 }
 0x690   :  { %v1314_v35 = vpop.eup %1313 }
 0x691   :  { %v466_v39 = vmul.f32 %v1314_v35, %v464_v38 }
 0x6f4   :  { %v469_v36 = vpop.permute.xlu0 %468 }
 0x6f5   :  { %v471_v37 = vmul.f32 %v1314_v35, %v469_v36 }
 0x6f7   :  { %473 = vrot.lane.b32.xlu1 %v471_v37, %s1436_s10 }
 0x769   :  { %v474_v40 = vpop.permute.xlu1 %473 }
 0x76a   :  { %v476_v41 = vadd.f32 %v474_v40, %v466_v39 }
 0x76c   :  { %1315 = vtanh.f32 %v476_v41  ;;  %v571_v58 = vrot.slane %v476_v41, 6 }
 0x776   :  { %v1316_v42 = vpop.eup %1315 }
 0x777   :  { %479 = vrot.lane.b32.xlu0 %v1316_v42, %s1437_s16 }
 0x7e9   :  { %v480_v43 = vpop.permute.xlu0 %479 }
 0x7ea   :  { %v482_v44 = vmul.f32 %v1314_v35, %v480_v43 }
 0x7ec   :  { %v484_v45 = vrot.slane %v482_v44, 4 }
 0x7ee   :  { %485 = vrot.lane.b32.xlu1 %v484_v45, %s1436_s10 }
 0x860   :  { %v486_v46 = vpop.permute.xlu1 %485 }
 0x861   :  { %1175 = vmatmul.mubr.msk.f32.vlgmr.msra.gmra.mrb[4].mxu0 %vm72_vm1, %v486_v46 }
 0x862   :  { %1259 = vmatpush3.bf16.msra.mxu0 %v1490_v6  ;;  %1196 = vmatprep.mubr.msk.f32.mxu0 %vm1433_vm0, %v1434_v1 }
 0x863   :  { %1260 = vmatprep.subr.bf16.mxu0 %v1432_v0 }
 0x866   :  { %1262 = vmatpush3.bf16.msra.mxu0 %v1499_v10 }
 0x867   :  { %1269 = vmatprep.subr.bf16.mxu0 %v1432_v0 }
 0x934   :  { %v555_v47 = vpop.f32.mrb[4].mxu0 }
 0x935   :  { %v560_v48 = vrot.slane %v555_v47, 2  ;;  %v1176_v49 = vpop.f32.mrb[5].mxu0 }
 0x937   :  { %v562_v50 = vadd.f32 %v560_v48, %v1527_v16 }
 0x939   :  { %1317 = vtanh.f32 %v562_v50  ;;  %v1068_v52 = vmul.f32 -1.442695, %v562_v50 }
 0x93b   :  { %1319 = vpow2.f32 %v1068_v52 }
 0x943   :  { %v1318_v51 = vpop.eup %1317 }
 0x944   :  { %575 = vrot.lane.b32.xlu0 %v1318_v51, %s1437_s16 }
 0x945   :  { %v1320_v53 = vpop.eup %1319 }
 0x946   :  { %v566_v54 = vadd.f32 1.0, %v1320_v53 }
 0x948   :  { %1321 = vrcp.f32 %v566_v54 }
 0x952   :  { %v1322_v55 = vpop.eup %1321 }
 0x953   :  { %v573_v59 = vmul.f32 %v1322_v55, %v571_v58 }
 0x9b6   :  { %v576_v56 = vpop.permute.xlu0 %575 }
 0x9b7   :  { %v578_v57 = vmul.f32 %v1322_v55, %v576_v56 }
 0x9b9   :  { %580 = vrot.lane.b32.xlu1 %v578_v57, %s1436_s10 }
 0xa2b   :  { %v581_v60 = vpop.permute.xlu1 %580 }
 0xa2c   :  { %v583_v61 = vadd.f32 %v581_v60, %v573_v59 }
 0xa2e   :  { %1323 = vtanh.f32 %v583_v61 }
 0xa38   :  { %v1324_v16 = vpop.eup %1323 }
 0xa39   :  { %586 = vrot.lane.b32.xlu0 %v1324_v16, %s1437_s16 }
 0xa3d   :  { %55 = vperm.xlu0 %1288, %v47_v62  }
 0xaab   :  { %v587_v63 = vpop.permute.xlu0 %586 }
 0xaac   :  { %v589_v2 = vmul.f32 %v1322_v55, %v587_v63 }
 0xaae   :  { %v591_v3 = vrot.slane %v589_v2, 6 }
 0xab0   :  { %592 = vrot.lane.b32.xlu1 %v591_v3, %s1436_s10 }
 0xabc   :  { %v56_v5 = vpop.permute.xlu0 %55 }
 0xabd   :  { %v63_v7 = vmul.f32 %v1518_v13, %v56_v5  ;;  %v675_v13 = vrot.slane %v583_v61, 6 }
 0xabf   :  { %v1600_v8 = vadd.f32 %v1524_v15, %v63_v7 }
 0xb22   :  { %v593_v4 = vpop.permute.xlu1 %592 }
 0xb23   :  { %1186 = vmatmul.mubr.msk.f32.vlgmr.msra.gmra.mrb[4].mxu1 %vm72_vm1, %v593_v4 }
 0xb24   :  { %1265 = vmatpush3.bf16.msra.mxu1 %v1490_v6  ;;  %1207 = vmatprep.mubr.msk.f32.mxu1 %vm1433_vm0, %v1434_v1 }
 0xb25   :  { %1266 = vmatprep.subr.bf16.mxu1 %v1432_v0 }
 0xb28   :  { %1268 = vmatpush3.bf16.msra.mxu1 %v1499_v10 }
 0xbf6   :  { %v662_v9 = vpop.f32.mrb[4].mxu1 }
 0xbf7   :  { %v666_v11 = vadd.f32 %v662_v9, %v1600_v8  ;;  %v1187_v12 = vpop.f32.mrb[5].mxu1 }
 0xbf9   :  { %1325 = vtanh.f32 %v666_v11  ;;  %v1070_v17 = vmul.f32 -1.442695, %v666_v11 }
 0xbfb   :  { %1327 = vpow2.f32 %v1070_v17 }
 0xc03   :  { %v1326_v14 = vpop.eup %1325 }
 0xc04   :  { %679 = vrot.lane.b32.xlu1 %v1326_v14, %s1437_s16 }
 0xc05   :  { %v1328_v18 = vpop.eup %1327 }
 0xc06   :  { %v670_v19 = vadd.f32 1.0, %v1328_v18 }
 0xc08   :  { %1329 = vrcp.f32 %v670_v19 }
 0xc12   :  { %v1330_v20 = vpop.eup %1329 }
 0xc13   :  { %v677_v15 = vmul.f32 %v1330_v20, %v675_v13 }
 0xc76   :  { %v680_v21 = vpop.permute.xlu1 %679 }
 0xc77   :  { %v682_v22 = vmul.f32 %v1330_v20, %v680_v21 }
 0xc79   :  { %684 = vrot.lane.b32.xlu0 %v682_v22, %s1436_s10 }
 0xceb   :  { %v685_v23 = vpop.permute.xlu0 %684 }
 0xcec   :  { %v687_v24 = vadd.f32 %v685_v23, %v677_v15 }
 0xcee   :  { %1331 = vtanh.f32 %v687_v24 }
 0xcf8   :  { %v1332_v25 = vpop.eup %1331 }
 0xcf9   :  { %690 = vrot.lane.b32.xlu1 %v1332_v25, %s1437_s16 }
 0xd6b   :  { %v691_v26 = vpop.permute.xlu1 %690 }
 0xd6c   :  { %v693_v27 = vmul.f32 %v1330_v20, %v691_v26 }
 0xd6e   :  { %695 = vrot.lane.b32.xlu0 %v693_v27, %s1436_s10 }
 0xde0   :  { %v696_v28 = vpop.permute.xlu0 %695 }
 0xde1   :  { %1197 = vmatmul.mubr.msk.f32.vlgmr.msra.gmra.mrb[6].mxu0 %vm72_vm1, %v696_v28 }
 0xde2   :  { %1271 = vmatpush3.bf16.msra.mxu0 %v1490_v6  ;;  %1218 = vmatprep.mubr.msk.f32.mxu0 %vm1433_vm0, %v1434_v1 }
 0xde3   :  { %1272 = vmatprep.subr.bf16.mxu0 %v1432_v0  ;;  %v781_v0 = vrot.slane %v687_v24, 6 }
 0xde6   :  { %1274 = vmatpush3.bf16.msra.mxu0 %v1499_v10 }
 0xeb4   :  { %v765_v29 = vpop.f32.mrb[6].mxu0 }
 0xeb5   :  { %v770_v30 = vrot.slane %v765_v29, 6  ;;  %v1198_v31 = vpop.f32.mrb[7].mxu0 }
 0xeb7   :  { %v772_v32 = vadd.f32 %v770_v30, %v1600_v8 }
 0xeb9   :  { %1333 = vtanh.f32 %v772_v32  ;;  %v1072_v34 = vmul.f32 -1.442695, %v772_v32 }
 0xebb   :  { %1335 = vpow2.f32 %v1072_v34 }
 0xec3   :  { %v1334_v33 = vpop.eup %1333 }
 0xec4   :  { %785 = vrot.lane.b32.xlu1 %v1334_v33, %s1437_s16 }
 0xec5   :  { %v1336_v35 = vpop.eup %1335 }
 0xec6   :  { %v776_v6 = vadd.f32 1.0, %v1336_v35 }
 0xec8   :  { %1337 = vrcp.f32 %v776_v6 }
 0xed2   :  { %v1338_v36 = vpop.eup %1337 }
 0xed3   :  { %v783_v10 = vmul.f32 %v1338_v36, %v781_v0 }
 0xf36   :  { %v786_v1 = vpop.permute.xlu1 %785 }
 0xf37   :  { %v788_v37 = vmul.f32 %v1338_v36, %v786_v1 }
 0xf39   :  { %790 = vrot.lane.b32.xlu0 %v788_v37, %s1436_s10 }
 0xfab   :  { %v791_v38 = vpop.permute.xlu0 %790 }
 0xfac   :  { %v793_v39 = vadd.f32 %v791_v38, %v783_v10 }
 0xfae   :  { %1339 = vtanh.f32 %v793_v39  ;;  %v888_v56 = vrot.slane %v793_v39, 6 }
 0xfb8   :  { %v1340_v40 = vpop.eup %1339 }
 0xfb9   :  { %796 = vrot.lane.b32.xlu1 %v1340_v40, %s1437_s16 }
0x102b   :  { %v797_v41 = vpop.permute.xlu1 %796 }
0x102c   :  { %v799_v42 = vmul.f32 %v1338_v36, %v797_v41 }
0x102e   :  { %v801_v43 = vrot.slane %v799_v42, 2 }
0x1030   :  { %802 = vrot.lane.b32.xlu0 %v801_v43, %s1436_s10 }
0x10a2   :  { %v803_v44 = vpop.permute.xlu0 %802 }
0x10a3   :  { %1208 = vmatmul.mubr.msk.f32.vlgmr.msra.gmra.mrb[6].mxu1 %vm72_vm1, %v803_v44 }
0x1176   :  { %v872_v45 = vpop.f32.mrb[6].mxu1 }
0x1177   :  { %v877_v46 = vrot.slane %v872_v45, 4  ;;  %v1209_v47 = vpop.f32.mrb[7].mxu1 }
0x1179   :  { %v879_v48 = vadd.f32 %v877_v46, %v1600_v8 }
0x117b   :  { %1341 = vtanh.f32 %v879_v48  ;;  %v1074_v50 = vmul.f32 -1.442695, %v879_v48 }
0x117d   :  { %1343 = vpow2.f32 %v1074_v50 }
0x1185   :  { %v1342_v49 = vpop.eup %1341 }
0x1186   :  { %892 = vrot.lane.b32.xlu1 %v1342_v49, %s1437_s16 }
0x1187   :  { %v1344_v51 = vpop.eup %1343 }
0x1188   :  { %v883_v52 = vadd.f32 1.0, %v1344_v51 }
0x118a   :  { %1345 = vrcp.f32 %v883_v52 }
0x1194   :  { %v1346_v53 = vpop.eup %1345 }
0x1195   :  { %v890_v57 = vmul.f32 %v1346_v53, %v888_v56 }
0x11f8   :  { %v893_v54 = vpop.permute.xlu1 %892 }
0x11f9   :  { %v895_v55 = vmul.f32 %v1346_v53, %v893_v54 }
0x11fb   :  { %897 = vrot.lane.b32.xlu0 %v895_v55, %s1436_s10 }
0x126d   :  { %v898_v58 = vpop.permute.xlu0 %897 }
0x126e   :  { %v900_v59 = vadd.f32 %v898_v58, %v890_v57 }
0x1270   :  { %1347 = vtanh.f32 %v900_v59  ;;  %v995_v19 = vrot.slane %v900_v59, 6 }
0x127a   :  { %v1348_v60 = vpop.eup %1347 }
0x127b   :  { %903 = vrot.lane.b32.xlu1 %v1348_v60, %s1437_s16 }
0x12ed   :  { %v904_v61 = vpop.permute.xlu1 %903 }
0x12ee   :  { %v906_v16 = vmul.f32 %v1346_v53, %v904_v61 }
0x12f0   :  { %v908_v62 = vrot.slane %v906_v16, 4 }
0x12f2   :  { %909 = vrot.lane.b32.xlu0 %v908_v62, %s1436_s10 }
0x1364   :  { %v910_v63 = vpop.permute.xlu0 %909 }
0x1365   :  { %1219 = vmatmul.mubr.msk.f32.vlgmr.msra.gmra.mrb[8].mxu0 %vm72_vm1, %v910_v63 }
0x1438   :  { %v979_v2 = vpop.f32.mrb[8].mxu0 }
0x1439   :  { %v984_v3 = vrot.slane %v979_v2, 2  ;;  %v1220_v4 = vpop.f32.mrb[9].mxu0 }
0x143b   :  { %v986_v5 = vadd.f32 %v984_v3, %v1600_v8 }
0x143d   :  { %1349 = vtanh.f32 %v986_v5  ;;  %v1076_v9 = vmul.f32 -1.442695, %v986_v5 }
0x143f   :  { %1351 = vpow2.f32 %v1076_v9 }
0x1447   :  { %v1350_v7 = vpop.eup %1349 }
0x1448   :  { %999 = vrot.lane.b32.xlu1 %v1350_v7, %s1437_s16 }
0x1449   :  { %v1352_v11 = vpop.eup %1351 }
0x144a   :  { %v990_v12 = vadd.f32 1.0, %v1352_v11 }
0x144c   :  { %1353 = vrcp.f32 %v990_v12 }
0x1456   :  { %v1354_v14 = vpop.eup %1353 }
0x1457   :  { %v997_v20 = vmul.f32 %v1354_v14, %v995_v19 }
0x14ba   :  { %v1000_v17 = vpop.permute.xlu1 %999 }
0x14bb   :  { %v1002_v18 = vmul.f32 %v1354_v14, %v1000_v17 }
0x14bd   :  { %1004 = vrot.lane.b32.xlu0 %v1002_v18, %s1436_s10 }
0x152f   :  { %v1005_v21 = vpop.permute.xlu0 %1004 }
0x1530   :  { %v1007_v22 = vadd.f32 %v1005_v21, %v997_v20 }
0x1532   :  { %1355 = vtanh.f32 %v1007_v22 }
0x153c   :  { %v1356_v8 = vpop.eup %1355 }
0x153d   :  { %1010 = vrot.lane.b32.xlu1 %v1356_v8, %s1437_s16 }
0x1541   :  { %1021 = vrot.lane.b32.xlu1 %v1007_v22, %s1438_s0 }
0x1542   :  { %1390 = shalt.err (!%p1387_p12)
}
0x1543   :  { %s1391_s25 = scalar_lea.hbm %s1660_s4, 32 }
0x1544   :  { %p1392_p13 = scmp.ne.s32.totalorder %s1660_s4, %s1391_s25  ;;  %p1395_p0 = scmp.lt.u32.totalorder %s1391_s25, %s1660_s4 }
0x1546   :  { %p1397_p1 = pnand %p1395_p0, %p1392_p13 }
0x1548   :  { %1400 = shalt.err (!%p1397_p1)
}
0x1549   :  { %1035 = dma.vmem_to_hbm [thread:$0]  %s1033_s21, 32, %s1660_s4, [#allocation4]   ;;  %vm1018_vm3 = vcmask 261126  }
0x154a   :  { %s1440_s3 = smov [#allocation6]  }
0x154b   :  { %s1041_s7 = sshll.u32 %s1440_s3, 4  ;;  %s1042_s7 = int_to_ptr.vmem [resolvable:$true] %s1041_s7 }
0x154c   :  { %s1401_s8 = scalar_lea.vmem %s1042_s7, 64  ;;  %p1406_p3 = scmp.lt.s32.totalorder %s1042_s7, %s1042_s7 }
0x154d   :  { %p1402_p2 = scmp.ne.s32.totalorder %s1042_s7, %s1401_s8  ;;  %p1407_p4 = scmp.lt.s32.totalorder %s1401_s8, %s1401_s8 }
0x154f   :  { %p1408_p5 = por %p1407_p4, %p1406_p3 }
0x1551   :  { %p1409_p6 = pnand %p1408_p5, %p1402_p2 }
0x15af   :  { %v1011_v13 = vpop.permute.xlu1 %1010 }
0x15b0   :  { %v1013_v15 = vmul.f32 %v1354_v14, %v1011_v13 }
0x15b2   :  { %1015 = vrot.lane.b32.xlu0 %v1013_v15, %s1436_s10 }
0x15b3   :  { %v1022_v23 = vpop.permute.xlu1 %1021 }
0x15b4   :  { %1025 = vst.msk [vmem:[#allocation6 - $0x4] sm:$0xc0] %vm1018_vm3, %v1022_v23 }
0x1624   :  { %v1016_v24 = vpop.permute.xlu0 %1015 }
0x1625   :  { %1019 = vst.msk [vmem:[#allocation6 - $0x6] sm:$0xc0] %vm1018_vm3, %v1016_v24 }
0x1626   :  { %1412 = shalt.err (!%p1409_p6)
}
0x1627   :  { %s1413_s11 = scalar_lea.hbm %s1661_s5, 64 }
0x1628   :  { %p1414_p7 = scmp.ne.s32.totalorder %s1661_s5, %s1413_s11  ;;  %p1417_p8 = scmp.lt.u32.totalorder %s1413_s11, %s1661_s5 }
0x162a   :  { %p1419_p9 = pnand %p1417_p8, %p1414_p7 }
0x162c   :  { %1422 = shalt.err (!%p1419_p9)
}
0x162d   :  { %s1441_s15 = smov 2  }
0x162e   :  { %1047 = dma.vmem_to_hbm [thread:$0]  %s1042_s7, 64, %s1661_s5, [#allocation7], %s1436_s10, %s1436_s10, %s1441_s15  }
0x162f   :  { %1425 = dma.done.wait [#allocation4], 32  }
0x1630   :  { %1426 = vsyncadd [#allocation4], 4294967264 }
0x1631   :  { %1427 = dma.done.wait [#allocation7], 64  }
0x1632   :  { %1428 = vsyncadd [#allocation7], 4294967232 }
0x1633   :  { %1054 = vsyncpa [#allocation3], 1 }
0x1634   :  { %1055 = vsyncpa [#allocation4], 1 }
0x1635   :  { %1056 = vsyncpa [#allocation7], 1 }

</bundles_post_ra>
